<compile_context>
chip_gen: v7x
topology: tpu7x:2x2x1
jax: 0.10.0
libtpu: 0.0.40
codegen_flags: <defaults>
</compile_context>

<pallas_src>
import jax
import jax.numpy as jnp
from jax.experimental import pallas as pl
from jax.experimental.pallas import tpu as pltpu

# ---- Leduc / net configuration (synthetic, deterministic) -------------------
N_CARDS = 6            # LeducRules.N_CARDS_IN_DECK
N_HANDS = N_CARDS      # one hand == one private card in Leduc
PUB_OBS_DIM = 32       # flattened public-observation feature size
MPM_UNITS = 64         # self._mpm.output_units
N_UNITS_FINAL = 64     # range_net_args.n_units_final
BATCH = 8

PAD_WIDTH = 128        # lane-dense padded feature width for hidden layers
CARD_PAD = 8           # N_CARDS padded to a sublane multiple for the one-hot
HAND_PAD = 8           # N_HANDS padded to 8 output columns (only these hit HBM)
_SUBLANE = 16          # batch-tile granularity (safe for bf16-packed sublanes)


def _round_up(x, m):
    return ((x + m - 1) // m) * m


def _pick_tile(b, cap=2048):
    """Padding-aware batch tile, multiple of 16, >=2 grid steps when possible."""
    tb = min(cap, _round_up(b, _SUBLANE))
    if b > tb:
        # Split into near-equal tiles so b_pad doesn't balloon past the cap.
        n_tiles = -(-b // tb)
        tb = _round_up(-(-b // n_tiles), _SUBLANE)
    if b >= 2 * _SUBLANE and _round_up(b, tb) // tb < 2:
        # Guarantee >=2 grid steps so the "parallel" axis shards across
        # v7x's two TensorCores.
        tb = _round_up(-(-b // 2), _SUBLANE)
    return tb


def rangenet_kernel(pub_ref, idx_ref, w1o_ref, w1c_ref, b1_ref,
                    w2_ref, b2_ref, w3_ref, b3_ref, o_ref):
    """Fused MPM + final_layer + out_layer + softmax for one batch tile."""
    tb = pub_ref.shape[0]

    # ---- MPM: Linear([pub_obs, one_hot(range_idx)]) + ReLU ------------------
    # The one-hot contribution is a row gather of W1's card rows, expressed
    # as a tiny (TB,8)x(8,128) matmul so it stays on the MXU.
    x = pub_ref[...]                                              # (TB, 32) bf16
    idx = idx_ref[...]                                            # (TB, 1) int32
    onehot = (jax.lax.broadcasted_iota(jnp.int32, (tb, CARD_PAD), 1)
              == idx).astype(jnp.bfloat16)                        # (TB, 8) bf16

    h1 = jnp.dot(x, w1o_ref[...], preferred_element_type=jnp.float32)
    h1 = h1 + jnp.dot(onehot, w1c_ref[...], preferred_element_type=jnp.float32)
    h1 = jnp.maximum(h1 + b1_ref[...], 0.0)                       # (TB, 128) f32

    # ---- final_layer: Linear + ReLU -----------------------------------------
    h2 = jnp.dot(h1.astype(jnp.bfloat16), w2_ref[...],
                 preferred_element_type=jnp.float32)
    h2 = jnp.maximum(h2 + b2_ref[...], 0.0)                       # (TB, 128) f32

    # ---- out_layer: Linear ----------------------------------------------------
    logits = jnp.dot(h2.astype(jnp.bfloat16), w3_ref[...],
                     preferred_element_type=jnp.float32) + b3_ref[...]

    # Mask padded hand columns so they get no probability mass.
    col = jax.lax.broadcasted_iota(jnp.int32, logits.shape, 1)
    logits = jnp.where(col < N_HANDS, logits, jnp.float32(-1e30))

    # ---- softmax over the hand axis (dim=1), exact normalization -------------
    m = jnp.max(logits, axis=-1, keepdims=True)
    e = jnp.exp(logits - m)
    denom = jnp.sum(e, axis=-1, keepdims=True)
    probs = e / denom                                             # (TB, 128) f32

    # Only the 8 (padded) hand columns are written back to HBM.
    o_ref[...] = probs[:, :HAND_PAD]                              # (TB, 8) f32


def rangenet_forward(pub_obses, range_idxs, params, *, tb=None):
    """pub_obses: (B, PUB_OBS_DIM) float; range_idxs: (B,) int32."""
    b = pub_obses.shape[0]
    w1o, w1c, b1, w2, b2, w3, b3 = params

    if tb is None:
        tb = _pick_tile(b)
    b_pad = _round_up(b, tb)

    # bf16 input in HBM: the kernel feeds the MXU bf16 anyway, so this halves
    # the dominant input DMA with no accuracy change.
    pub = pub_obses.astype(jnp.bfloat16)
    idx = range_idxs.astype(jnp.int32).reshape(b, 1)
    if b_pad != b:
        pub = jnp.pad(pub, ((0, b_pad - b), (0, 0)))
        idx = jnp.pad(idx, ((0, b_pad - b), (0, 0)))

    row = lambda shape: pl.BlockSpec(shape, lambda i: (i, 0))     # batch-tiled
    fixed = lambda shape: pl.BlockSpec(shape, lambda i: (0, 0))   # VMEM-resident

    out_pad = pl.pallas_call(
        rangenet_kernel,
        out_shape=jax.ShapeDtypeStruct((b_pad, HAND_PAD), jnp.float32),
        grid=(b_pad // tb,),
        in_specs=[
            row((tb, PUB_OBS_DIM)),            # pub_obses, bf16
            row((tb, 1)),                      # range_idxs
            fixed((PUB_OBS_DIM, PAD_WIDTH)),   # W1 (pub-obs rows), bf16
            fixed((CARD_PAD, PAD_WIDTH)),      # W1 (card one-hot rows), bf16
            fixed((1, PAD_WIDTH)),             # b1
            fixed((PAD_WIDTH, PAD_WIDTH)),     # W2, bf16
            fixed((1, PAD_WIDTH)),             # b2
            fixed((PAD_WIDTH, PAD_WIDTH)),     # W3, bf16
            fixed((1, PAD_WIDTH)),             # b3
        ],
        out_specs=row((tb, HAND_PAD)),
        compiler_params=pltpu.CompilerParams(
            dimension_semantics=("parallel",),
            vmem_limit_bytes=32 * 1024 * 1024),
    )(pub, idx, w1o, w1c, b1, w2, b2, w3, b3)

    # Narrow output: this slice only touches 8 lanes/row (was 128 f32 lanes).
    return out_pad[:b, :N_HANDS]


def init_params(key):
    """Deterministic synthetic weights, zero-padded to lane-dense 128 width."""
    in_dim = PUB_OBS_DIM + N_CARDS
    k1, k2, k3, k4, k5, k6 = jax.random.split(key, 6)
    w1 = jax.random.normal(k1, (in_dim, MPM_UNITS), jnp.float32) * 0.1
    w2 = jax.random.normal(k2, (MPM_UNITS, N_UNITS_FINAL), jnp.float32) * 0.1
    w3 = jax.random.normal(k3, (N_UNITS_FINAL, N_HANDS), jnp.float32) * 0.1
    b1 = jax.random.normal(k4, (MPM_UNITS,), jnp.float32) * 0.05
    b2 = jax.random.normal(k5, (N_UNITS_FINAL,), jnp.float32) * 0.05
    b3 = jax.random.normal(k6, (N_HANDS,), jnp.float32) * 0.05

    w1o = jnp.zeros((PUB_OBS_DIM, PAD_WIDTH), jnp.float32)
    w1o = w1o.at[:, :MPM_UNITS].set(w1[:PUB_OBS_DIM])
    w1c = jnp.zeros((CARD_PAD, PAD_WIDTH), jnp.float32)
    w1c = w1c.at[:N_CARDS, :MPM_UNITS].set(w1[PUB_OBS_DIM:])
    w2p = jnp.zeros((PAD_WIDTH, PAD_WIDTH), jnp.float32)
    w2p = w2p.at[:MPM_UNITS, :N_UNITS_FINAL].set(w2)
    w3p = jnp.zeros((PAD_WIDTH, PAD_WIDTH), jnp.float32)
    w3p = w3p.at[:N_UNITS_FINAL, :N_HANDS].set(w3)

    b1p = jnp.zeros((1, PAD_WIDTH), jnp.float32).at[0, :MPM_UNITS].set(b1)
    b2p = jnp.zeros((1, PAD_WIDTH), jnp.float32).at[0, :N_UNITS_FINAL].set(b2)
    b3p = jnp.zeros((1, PAD_WIDTH), jnp.float32).at[0, :N_HANDS].set(b3)

    # bf16 weights for the MXU; biases stay f32 (f32 epilogue).
    return (w1o.astype(jnp.bfloat16), w1c.astype(jnp.bfloat16), b1p,
            w2p.astype(jnp.bfloat16), b2p,
            w3p.astype(jnp.bfloat16), b3p)


def rangenet_reference(pub_obses, range_idxs, params):
    """Pure-JAX f32 reference (same padded weights, no bf16)."""
    w1o, w1c, b1, w2, b2, w3, b3 = [p.astype(jnp.float32) for p in params]
    onehot = jax.nn.one_hot(range_idxs, CARD_PAD, dtype=jnp.float32)
    h1 = jax.nn.relu(pub_obses @ w1o + onehot @ w1c + b1)
    h2 = jax.nn.relu(h1 @ w2 + b2)
    logits = (h2 @ w3 + b3)[:, :N_HANDS]
    return jax.nn.softmax(logits, axis=1)


def _check(pub_obses, range_idxs, params):
    out = jax.block_until_ready(rangenet_forward(pub_obses, range_idxs, params))
    b = pub_obses.shape[0]
    assert out.shape == (b, N_HANDS)
    assert bool(jnp.all(out >= 0.0))
    # Exact softmax normalization (no approx reciprocal).
    assert bool(jnp.allclose(jnp.sum(out, axis=1), 1.0, atol=1e-5))
    # Agreement with the f32 reference (bf16 matmul tolerance).
    ref = rangenet_reference(pub_obses, range_idxs, params)
    assert bool(jnp.allclose(out, ref, atol=3e-2))
    return out


if __name__ == "__main__":
    key = jax.random.PRNGKey(0)
    kp, kx, ki, kx2, ki2 = jax.random.split(key, 5)

    params = init_params(kp)

    # Small primary case (single grid step).
    pub_obses = jax.random.normal(kx, (BATCH, PUB_OBS_DIM), jnp.float32)
    range_idxs = jax.random.randint(ki, (BATCH,), 0, N_CARDS, jnp.int32)
    _check(pub_obses, range_idxs, params)

    # Second small case that exercises multi-tile grid + batch padding.
    pub2 = jax.random.normal(kx2, (40, PUB_OBS_DIM), jnp.float32)
    idx2 = jax.random.randint(ki2, (40,), 0, N_CARDS, jnp.int32)
    _check(pub2, idx2, params)

    print("KERNEL_OK")
</pallas_src>

<mosaic_0001>
module attributes {stable_mosaic.version = 11 : i64} {
  func.func @rangenet_kernel(%arg0: i32, %arg1: memref<16x32xbf16, #tpu.memory_space<vmem>>, %arg2: memref<16x1xi32, #tpu.memory_space<vmem>>, %arg3: memref<32x128xbf16, #tpu.memory_space<vmem>>, %arg4: memref<8x128xbf16, #tpu.memory_space<vmem>>, %arg5: memref<1x128xf32, #tpu.memory_space<vmem>>, %arg6: memref<128x128xbf16, #tpu.memory_space<vmem>>, %arg7: memref<1x128xf32, #tpu.memory_space<vmem>>, %arg8: memref<128x128xbf16, #tpu.memory_space<vmem>>, %arg9: memref<1x128xf32, #tpu.memory_space<vmem>>, %arg10: memref<16x8xf32, #tpu.memory_space<vmem>>) attributes {dimension_semantics = [#tpu.dimension_semantics<parallel>], iteration_bounds = array<i64: 1>, scalar_prefetch = 0 : i64, scratch_operands = 0 : i64, tpu.core_type = #tpu.core_type<tc>, window_params = [{transform_indices = @transform_0, window_bounds = array<i64: 16, 32>}, {transform_indices = @transform_1, window_bounds = array<i64: 16, 1>}, {pipeline_mode = #tpu.pipeline_mode<synchronous>, transform_indices = @transform_2, window_bounds = array<i64: 32, 128>}, {pipeline_mode = #tpu.pipeline_mode<synchronous>, transform_indices = @transform_3, window_bounds = array<i64: 8, 128>}, {pipeline_mode = #tpu.pipeline_mode<synchronous>, transform_indices = @transform_4, window_bounds = array<i64: 1, 128>}, {pipeline_mode = #tpu.pipeline_mode<synchronous>, transform_indices = @transform_5, window_bounds = array<i64: 128, 128>}, {pipeline_mode = #tpu.pipeline_mode<synchronous>, transform_indices = @transform_6, window_bounds = array<i64: 1, 128>}, {pipeline_mode = #tpu.pipeline_mode<synchronous>, transform_indices = @transform_7, window_bounds = array<i64: 128, 128>}, {pipeline_mode = #tpu.pipeline_mode<synchronous>, transform_indices = @transform_8, window_bounds = array<i64: 1, 128>}, {transform_indices = @transform_9, window_bounds = array<i64: 16, 8>}]} {
    %c0 = arith.constant 0 : index
    %c0_0 = arith.constant 0 : index
    %0 = vector.load %arg1[%c0, %c0_0] : memref<16x32xbf16, #tpu.memory_space<vmem>>, vector<16x32xbf16>
    %c0_1 = arith.constant 0 : index
    %c0_2 = arith.constant 0 : index
    %1 = vector.load %arg2[%c0_1, %c0_2] : memref<16x1xi32, #tpu.memory_space<vmem>>, vector<16x1xi32>
    %2 = tpu.iota {dimensions = array<i32: 1>} : vector<16x8xi32>
    %3 = vector.broadcast %1 : vector<16x1xi32> to vector<16x8xi32>
    %4 = arith.cmpi eq, %2, %3 : vector<16x8xi32>
    %5 = arith.extui %4 : vector<16x8xi1> to vector<16x8xi32>
    %6 = arith.sitofp %5 : vector<16x8xi32> to vector<16x8xf32>
    %7 = arith.truncf %6 : vector<16x8xf32> to vector<16x8xbf16>
    %c0_3 = arith.constant 0 : index
    %c0_4 = arith.constant 0 : index
    %8 = vector.load %arg3[%c0_3, %c0_4] : memref<32x128xbf16, #tpu.memory_space<vmem>>, vector<32x128xbf16>
    %cst = arith.constant dense<0.000000e+00> : vector<16x128xf32>
    %9 = tpu.matmul %0, %8, %cst {dimension_numbers = #tpu.dot_dimension_numbers<[1], [0], [0], [1], [0, 0, 1, 1], [], []>} : vector<16x32xbf16>, vector<32x128xbf16>, vector<16x128xf32> -> vector<16x128xf32>
    %c0_5 = arith.constant 0 : index
    %c0_6 = arith.constant 0 : index
    %10 = vector.load %arg4[%c0_5, %c0_6] : memref<8x128xbf16, #tpu.memory_space<vmem>>, vector<8x128xbf16>
    %cst_7 = arith.constant dense<0.000000e+00> : vector<16x128xf32>
    %11 = tpu.matmul %7, %10, %cst_7 {dimension_numbers = #tpu.dot_dimension_numbers<[1], [0], [0], [1], [0, 0, 1, 1], [], []>} : vector<16x8xbf16>, vector<8x128xbf16>, vector<16x128xf32> -> vector<16x128xf32>
    %12 = arith.addf %9, %11 : vector<16x128xf32>
    %c0_8 = arith.constant 0 : index
    %c0_9 = arith.constant 0 : index
    %13 = vector.load %arg5[%c0_8, %c0_9] : memref<1x128xf32, #tpu.memory_space<vmem>>, vector<1x128xf32>
    %14 = vector.broadcast %13 : vector<1x128xf32> to vector<16x128xf32>
    %15 = arith.addf %12, %14 : vector<16x128xf32>
    %cst_10 = arith.constant 0.000000e+00 : f32
    %16 = vector.broadcast %cst_10 : f32 to vector<16x128xf32>
    %17 = arith.maximumf %15, %16 : vector<16x128xf32>
    %18 = arith.truncf %17 : vector<16x128xf32> to vector<16x128xbf16>
    %c0_11 = arith.constant 0 : index
    %c0_12 = arith.constant 0 : index
    %19 = vector.load %arg6[%c0_11, %c0_12] : memref<128x128xbf16, #tpu.memory_space<vmem>>, vector<128x128xbf16>
    %cst_13 = arith.constant dense<0.000000e+00> : vector<16x128xf32>
    %20 = tpu.matmul %18, %19, %cst_13 {dimension_numbers = #tpu.dot_dimension_numbers<[1], [0], [0], [1], [0, 0, 1, 1], [], []>} : vector<16x128xbf16>, vector<128x128xbf16>, vector<16x128xf32> -> vector<16x128xf32>
    %c0_14 = arith.constant 0 : index
    %c0_15 = arith.constant 0 : index
    %21 = vector.load %arg7[%c0_14, %c0_15] : memref<1x128xf32, #tpu.memory_space<vmem>>, vector<1x128xf32>
    %22 = vector.broadcast %21 : vector<1x128xf32> to vector<16x128xf32>
    %23 = arith.addf %20, %22 : vector<16x128xf32>
    %cst_16 = arith.constant 0.000000e+00 : f32
    %24 = vector.broadcast %cst_16 : f32 to vector<16x128xf32>
    %25 = arith.maximumf %23, %24 : vector<16x128xf32>
    %26 = arith.truncf %25 : vector<16x128xf32> to vector<16x128xbf16>
    %c0_17 = arith.constant 0 : index
    %c0_18 = arith.constant 0 : index
    %27 = vector.load %arg8[%c0_17, %c0_18] : memref<128x128xbf16, #tpu.memory_space<vmem>>, vector<128x128xbf16>
    %cst_19 = arith.constant dense<0.000000e+00> : vector<16x128xf32>
    %28 = tpu.matmul %26, %27, %cst_19 {dimension_numbers = #tpu.dot_dimension_numbers<[1], [0], [0], [1], [0, 0, 1, 1], [], []>} : vector<16x128xbf16>, vector<128x128xbf16>, vector<16x128xf32> -> vector<16x128xf32>
    %c0_20 = arith.constant 0 : index
    %c0_21 = arith.constant 0 : index
    %29 = vector.load %arg9[%c0_20, %c0_21] : memref<1x128xf32, #tpu.memory_space<vmem>>, vector<1x128xf32>
    %30 = vector.broadcast %29 : vector<1x128xf32> to vector<16x128xf32>
    %31 = arith.addf %28, %30 : vector<16x128xf32>
    %32 = tpu.iota {dimensions = array<i32: 1>} : vector<16x128xi32>
    %c6_i32 = arith.constant 6 : i32
    %33 = vector.broadcast %c6_i32 : i32 to vector<16x128xi32>
    %34 = arith.cmpi slt, %32, %33 : vector<16x128xi32>
    %cst_22 = arith.constant -1.000000e+30 : f32
    %35 = vector.broadcast %cst_22 : f32 to vector<16x128xf32>
    %36 = arith.select %34, %31, %35 : vector<16x128xi1>, vector<16x128xf32>
    %cst_23 = arith.constant dense<0xFF800000> : vector<16xf32>
    %37 = vector.multi_reduction <maximumf>, %36, %cst_23 [1] : vector<16x128xf32> to vector<16xf32>
    %38 = vector.shape_cast %37 : vector<16xf32> to vector<16x1xf32>
    %39 = vector.broadcast %38 : vector<16x1xf32> to vector<16x128xf32>
    %40 = arith.subf %36, %39 : vector<16x128xf32>
    %41 = math.exp %40 : vector<16x128xf32>
    %cst_24 = arith.constant dense<0.000000e+00> : vector<16xf32>
    %42 = vector.multi_reduction <add>, %41, %cst_24 [1] : vector<16x128xf32> to vector<16xf32>
    %43 = vector.shape_cast %42 : vector<16xf32> to vector<16x1xf32>
    %44 = vector.broadcast %43 : vector<16x1xf32> to vector<16x128xf32>
    %45 = arith.divf %41, %44 : vector<16x128xf32>
    %46 = vector.extract_strided_slice %45 {offsets = [0, 0], sizes = [16, 8], strides = [1, 1]} : vector<16x128xf32> to vector<16x8xf32>
    %c0_25 = arith.constant 0 : index
    %c0_26 = arith.constant 0 : index
    %47 = vector.load %arg10[%c0_25, %c0_26] : memref<16x8xf32, #tpu.memory_space<vmem>>, vector<16x8xf32>
    tpu.vector_store %arg10[%c0_25, %c0_26], %46 {strides = array<i32>} : memref<16x8xf32, #tpu.memory_space<vmem>>, vector<16x8xf32>,
    return
  }
  func.func @transform_0(%arg0: i32) -> (i32, i32) {
    %c0_i32 = arith.constant 0 : i32
    %c0_i32_0 = arith.constant 0 : i32
    return %arg0, %c0_i32 : i32, i32
  }
  func.func @transform_1(%arg0: i32) -> (i32, i32) {
    %c0_i32 = arith.constant 0 : i32
    %c0_i32_0 = arith.constant 0 : i32
    return %arg0, %c0_i32 : i32, i32
  }
  func.func @transform_2(%arg0: i32) -> (i32, i32) {
    %c0_i32 = arith.constant 0 : i32
    %c0_i32_0 = arith.constant 0 : i32
    %c0_i32_1 = arith.constant 0 : i32
    return %c0_i32, %c0_i32_0 : i32, i32
  }
  func.func @transform_3(%arg0: i32) -> (i32, i32) {
    %c0_i32 = arith.constant 0 : i32
    %c0_i32_0 = arith.constant 0 : i32
    %c0_i32_1 = arith.constant 0 : i32
    return %c0_i32, %c0_i32_0 : i32, i32
  }
  func.func @transform_4(%arg0: i32) -> (i32, i32) {
    %c0_i32 = arith.constant 0 : i32
    %c0_i32_0 = arith.constant 0 : i32
    %c0_i32_1 = arith.constant 0 : i32
    return %c0_i32, %c0_i32_0 : i32, i32
  }
  func.func @transform_5(%arg0: i32) -> (i32, i32) {
    %c0_i32 = arith.constant 0 : i32
    %c0_i32_0 = arith.constant 0 : i32
    %c0_i32_1 = arith.constant 0 : i32
    return %c0_i32, %c0_i32_0 : i32, i32
  }
  func.func @transform_6(%arg0: i32) -> (i32, i32) {
    %c0_i32 = arith.constant 0 : i32
    %c0_i32_0 = arith.constant 0 : i32
    %c0_i32_1 = arith.constant 0 : i32
    return %c0_i32, %c0_i32_0 : i32, i32
  }
  func.func @transform_7(%arg0: i32) -> (i32, i32) {
    %c0_i32 = arith.constant 0 : i32
    %c0_i32_0 = arith.constant 0 : i32
    %c0_i32_1 = arith.constant 0 : i32
    return %c0_i32, %c0_i32_0 : i32, i32
  }
  func.func @transform_8(%arg0: i32) -> (i32, i32) {
    %c0_i32 = arith.constant 0 : i32
    %c0_i32_0 = arith.constant 0 : i32
    %c0_i32_1 = arith.constant 0 : i32
    return %c0_i32, %c0_i32_0 : i32, i32
  }
  func.func @transform_9(%arg0: i32) -> (i32, i32) {
    %c0_i32 = arith.constant 0 : i32
    %c0_i32_0 = arith.constant 0 : i32
    return %arg0, %c0_i32 : i32, i32
  }
}

</mosaic_0001>

<bundles_post_ra>
// kernel: tpu_custom_call.1
= control target key start
LH: loop header
LB: loop body
LE: loop exit
PB: predicated region body
PF: predicated region fallthrough
CT: control target
= control target key end

     0   :  { %14 = vsyncpa [#allocation3], 0  ;;  %s801_s0 = inlined_call_operand.vmem [shape: bf16[16,32], index: 0, kind: input, shape index: {}]   ;;  %s802_s1 = inlined_call_operand.vmem [shape: s32[16,1], index: 1, kind: input, shape index: {}]   ;;  %s803_s2 = inlined_call_operand.vmem [shape: bf16[32,128], index: 2, kind: input, shape index: {}]   ;;  %s804_s3 = inlined_call_operand.vmem [shape: bf16[8,128], index: 3, kind: input, shape index: {}]   ;;  %s805_s4 = inlined_call_operand.vmem [shape: f32[1,128], index: 4, kind: input, shape index: {}]   ;;  %s806_s5 = inlined_call_operand.hbm [shape: bf16[128,128], index: 5, kind: input, shape index: {}]   ;;  %s807_s6 = inlined_call_operand.vmem [shape: f32[1,128], index: 6, kind: input, shape index: {}]   ;;  %s808_s7 = inlined_call_operand.hbm [shape: bf16[128,128], index: 7, kind: input, shape index: {}]   ;;  %s809_s8 = inlined_call_operand.vmem [shape: f32[1,128], index: 8, kind: input, shape index: {}]   ;;  %s810_s9 = inlined_call_operand.vmem [shape: f32[16,8], index: 9, kind: output, shape index: {}]  }
   0x1   :  { %15 = vsyncpa [#allocation5], 0  ;;  %s650_s30 = smov [#allocation2]   ;;  %s602_s13 = scalar_lea.hbm %s806_s5, 1024 }
   0x2   :  { %s31_s10 = sshll.u32 %s650_s30, 4  ;;  %p603_p0 = scmp.ne.s32.totalorder %s806_s5, %s602_s13  ;;  %s32_s10 = int_to_ptr.vmem [resolvable:$true] %s31_s10 }
   0x3   :  { %p606_p1 = scmp.lt.u32.totalorder %s602_s13, %s806_s5 }
   0x5   :  { %p608_p2 = pnand %p606_p1, %p603_p0 }
   0x7   :  { %611 = shalt.err (!%p608_p2)
}
   0x8   :  { %s612_s18 = scalar_lea.vmem %s32_s10, 1024  ;;  %p617_p4 = scmp.lt.s32.totalorder %s32_s10, %s32_s10 }
   0x9   :  { %p613_p3 = scmp.ne.s32.totalorder %s32_s10, %s612_s18  ;;  %p618_p5 = scmp.lt.s32.totalorder %s612_s18, %s612_s18 }
   0xb   :  { %p619_p6 = por %p618_p5, %p617_p4 }
   0xd   :  { %p620_p7 = pnand %p619_p6, %p613_p3 }
   0xf   :  { %623 = shalt.err (!%p620_p7)
}
  0x10   :  { %s651_s19 = smov 64   ;;  %s652_s20 = smov 4  }
  0x11   :  { %37 = dma.hbm_to_vmem [thread:$0]  %s806_s5, 1024, %s32_s10, [#allocation3], %s651_s19, %s651_s19, %s652_s20  }
  0x12   :  { %s653_s23 = smov [#allocation4]   ;;  %s624_s27 = scalar_lea.hbm %s808_s7, 1024 }
  0x13   :  { %s45_s24 = sshll.u32 %s653_s23, 4  ;;  %p625_p8 = scmp.ne.s32.totalorder %s808_s7, %s624_s27  ;;  %s46_s24 = int_to_ptr.vmem [resolvable:$true] %s45_s24 }
  0x14   :  { %p628_p9 = scmp.lt.u32.totalorder %s624_s27, %s808_s7 }
  0x16   :  { %p630_p10 = pnand %p628_p9, %p625_p8 }
  0x18   :  { %633 = shalt.err (!%p630_p10)
}
  0x19   :  { %s634_s12 = scalar_lea.vmem %s46_s24, 1024  ;;  %p639_p12 = scmp.lt.s32.totalorder %s46_s24, %s46_s24 }
  0x1a   :  { %p635_p11 = scmp.ne.s32.totalorder %s46_s24, %s634_s12  ;;  %p640_p13 = scmp.lt.s32.totalorder %s634_s12, %s634_s12 }
  0x1c   :  { %p641_p0 = por %p640_p13, %p639_p12 }
  0x1e   :  { %p642_p1 = pnand %p641_p0, %p635_p11 }
  0x20   :  { %645 = shalt.err (!%p642_p1)
}
  0x21   :  { %51 = dma.hbm_to_vmem [thread:$0]  %s808_s7, 1024, %s46_s24, [#allocation5], %s651_s19, %s651_s19, %s652_s20  }
  0x22   :  { %646 = dma.done.wait [#allocation3], 1024  }
  0x23   :  { %647 = vsyncadd [#allocation3], 4294966272 }
  0x24   :  { %648 = dma.done.wait [#allocation5], 1024  }
  0x25   :  { %649 = vsyncadd [#allocation5], 4294966272  ;;  %v654_v0 = vmov 0   ;;  %v655_v1 = vmov 0.0   ;;  %v63_v2 = vld [vmem:[%s802_s1] sm:$0xff]  ;;  %v64_v3 = vld [vmem:[%s802_s1 + $0x8] sm:$0xff]  ;;  %v65_v9 = vlaneseq }
  0x26   :  { %574 = vset.pattern.permute.xlu0 %v654_v0  ;;  %519 = vmatprep.subr.bf16.mxu1 %v655_v1  ;;  %v575_v4 = vld [vmem:[%s803_s2] sm:$0xff]   ;;  %v576_v5 = vld [vmem:[%s803_s2 + $0x8] sm:$0xff]   ;;  %vm89_vm0 = vcmask 1043456   ;;  %vm656_vm1 = vmmov 0   ;;  %vm151_vm2 = vcmask 261120   ;;  %vm85_vm5 = vcmask 64512  }
  0x27   :  { %513 = vmatprep.subr.bf16.mxu0 %v655_v1  ;;  %68 = vperm.xlu0 %574, %v63_v2   ;;  %v84_v6 = vld [vmem:[%s804_s3] sm:$0xf]  ;;  %v760_v10 = vand.u32 127, %v65_v9  ;;  %v579_v17 = vld [vmem:[#allocation2 + $0x8] sm:$0xff]   ;;  %v580_v18 = vld [vmem:[#allocation2 + $0x10] sm:$0xff]  }
  0x28   :  { %520 = vmatpush3.bf16.msra.mxu1 %v575_v4  ;;  %523 = vmatprep.mubr.msk.bf16.mxu1 %vm656_vm1, %v655_v1  ;;  %v91_v7 = vsel %vm89_vm0, %v84_v6, 0  ;;  %v577_v8 = vld [vmem:[%s801_s0] sm:$0xff]   ;;  %v581_v19 = vld [vmem:[#allocation2 + $0x18] sm:$0xff]   ;;  %v583_v21 = vld [vmem:[#allocation2 + $0x28] sm:$0xff]  }
  0x29   :  { %521 = vmatprep.subr.bf16.mxu1 %v655_v1  ;;  %514 = vmatpush3.bf16.msra.mxu0 %v91_v7  ;;  %v578_v15 = vld [vmem:[#allocation2] sm:$0xff]   ;;  %v584_v24 = vld [vmem:[#allocation2 + $0x30] sm:$0xff]   ;;  %v585_v27 = vld [vmem:[#allocation2 + $0x38] sm:$0xff]   ;;  %vm435_vm6 = vcmp.lt.s32.totalorder %v760_v10, 6 }
  0x2a   :  { %515 = vmatprep.mubr.msk.bf16.mxu0 %vm656_vm1, %v655_v1  ;;  %527 = vmatprep.subr.bf16.mxu0 %v655_v1  ;;  %v582_v20 = vld [vmem:[#allocation2 + $0x20] sm:$0xff]   ;;  %v587_v29 = vld [vmem:[#allocation4 + $0x8] sm:$0xff]   ;;  %v588_v30 = vld [vmem:[#allocation4 + $0x10] sm:$0xff]  }
  0x2b   :  { %71 = vperm.xlu0 %574, %v64_v3   ;;  %v586_v28 = vld [vmem:[#allocation4] sm:$0xff]   ;;  %v589_v31 = vld [vmem:[#allocation4 + $0x18] sm:$0xff]   ;;  %v591_v33 = vld [vmem:[#allocation4 + $0x28] sm:$0xff]  }
  0x2c   :  { %522 = vmatpush3.bf16.msra.mxu1 %v576_v5  ;;  %v590_v32 = vld [vmem:[#allocation4 + $0x20] sm:$0xff]   ;;  %v592_v46 = vld [vmem:[#allocation4 + $0x30] sm:$0xff]   ;;  %v593_v47 = vld [vmem:[#allocation4 + $0x38] sm:$0xff]  }
  0x2d   :  { %547 = vmatprep.subr.bf16.mxu1 %v655_v1  ;;  %v471_v35 = vld [vmem:[%s805_s4] ss:$0 sm:$0xff] }
  0x2e   :  { %v472_v48 = vld [vmem:[%s807_s6] ss:$0 sm:$0xff] }
  0x2f   :  { %524 = vmatmul.mubr.msk.bf16.vlgmr.msra.gmra.mrb[0].mxu1 %vm151_vm2, %v577_v8  ;;  %v481_v58 = vld [vmem:[%s809_s8] ss:$0 sm:$0xff] }
  0x30   :  { %563 = vmatprep.mubr.msk.bf16.mxu1 %vm656_vm1, %v655_v1  ;;  %548 = vmatpush3.bf16.msra.mxu1 %v586_v28 }
  0x31   :  { %549 = vmatprep.subr.bf16.mxu1 %v655_v1 }
  0x34   :  { %550 = vmatpush3.bf16.msra.mxu1 %v587_v29 }
  0x35   :  { %551 = vmatprep.subr.bf16.mxu1 %v655_v1 }
  0x38   :  { %552 = vmatpush3.bf16.msra.mxu1 %v588_v30 }
  0x39   :  { %553 = vmatprep.subr.bf16.mxu1 %v655_v1 }
  0x3c   :  { %554 = vmatpush3.bf16.msra.mxu1 %v589_v31 }
  0x3d   :  { %555 = vmatprep.subr.bf16.mxu1 %v655_v1 }
  0x40   :  { %556 = vmatpush3.bf16.msra.mxu1 %v590_v32 }
  0x41   :  { %557 = vmatprep.subr.bf16.mxu1 %v655_v1 }
  0x44   :  { %558 = vmatpush3.bf16.msra.mxu1 %v591_v33 }
  0x45   :  { %559 = vmatprep.subr.bf16.mxu1 %v655_v1 }
  0x48   :  { %560 = vmatpush3.bf16.msra.mxu1 %v592_v46 }
  0x49   :  { %561 = vmatprep.subr.bf16.mxu1 %v655_v1 }
  0x4c   :  { %562 = vmatpush3.bf16.msra.mxu1 %v593_v47 }
  0xa6   :  { %v69_v11 = vpop.permute.xlu0 %68 }
  0xa7   :  { %vm73_vm3 = vcmp.eq.s32.totalorder %v760_v10, %v69_v11 }
  0xa8   :  { %v464_v13 = vsel %vm73_vm3, 1.0, %v655_v1 }
  0xaa   :  { %v72_v12 = vpop.permute.xlu0 %71 }
  0xab   :  { %vm74_vm4 = vcmp.eq.s32.totalorder %v760_v10, %v72_v12 }
  0xac   :  { %v465_v14 = vsel %vm74_vm4, 1.0, %v655_v1 }
  0xad   :  { %v79_v16 = vpack.c.bf16 %v465_v14, %v464_v13 }
  0xaf   :  { %516 = vmatmul.mubr.msk.bf16.vlgmr.msra.gmra.mrb[0].mxu0 %vm85_vm5, %v79_v16 }
  0xb0   :  { %528 = vmatpush3.bf16.msra.mxu0 %v578_v15  ;;  %543 = vmatprep.mubr.msk.bf16.mxu0 %vm656_vm1, %v655_v1 }
  0xb1   :  { %529 = vmatprep.subr.bf16.mxu0 %v655_v1 }
  0xb4   :  { %530 = vmatpush3.bf16.msra.mxu0 %v579_v17 }
  0xb5   :  { %531 = vmatprep.subr.bf16.mxu0 %v655_v1 }
  0xb8   :  { %532 = vmatpush3.bf16.msra.mxu0 %v580_v18 }
  0xb9   :  { %533 = vmatprep.subr.bf16.mxu0 %v655_v1 }
  0xbc   :  { %534 = vmatpush3.bf16.msra.mxu0 %v581_v19 }
  0xbd   :  { %535 = vmatprep.subr.bf16.mxu0 %v655_v1 }
  0xc0   :  { %536 = vmatpush3.bf16.msra.mxu0 %v582_v20 }
  0xc1   :  { %537 = vmatprep.subr.bf16.mxu0 %v655_v1 }
  0xc4   :  { %538 = vmatpush3.bf16.msra.mxu0 %v583_v21 }
  0xc5   :  { %539 = vmatprep.subr.bf16.mxu0 %v655_v1 }
  0xc8   :  { %540 = vmatpush3.bf16.msra.mxu0 %v584_v24 }
  0xc9   :  { %541 = vmatprep.subr.bf16.mxu0 %v655_v1 }
  0xcc   :  { %542 = vmatpush3.bf16.msra.mxu0 %v585_v27 }
 0x102   :  { %v189_v22 = vpop.f32.mrb[0].mxu1 }
 0x103   :  { %v525_v23 = vpop.f32.mrb[1].mxu1 }
 0x104   :  { %v192_v25 = vpop.f32.mrb[2].mxu1 }
 0x105   :  { %v526_v26 = vpop.f32.mrb[3].mxu1 }
 0x182   :  { %v127_v34 = vpop.f32.mrb[0].mxu0 }
 0x183   :  { %v190_v36 = vadd.f32 %v189_v22, %v127_v34  ;;  %v517_v37 = vpop.f32.mrb[1].mxu0 }
 0x184   :  { %v130_v38 = vpop.f32.mrb[2].mxu0 }
 0x185   :  { %v203_v39 = vadd.f32 %v471_v35, %v190_v36  ;;  %v193_v40 = vadd.f32 %v192_v25, %v130_v38  ;;  %v518_v41 = vpop.f32.mrb[3].mxu0 }
 0x187   :  { %v204_v42 = vadd.f32 %v471_v35, %v193_v40  ;;  %v205_v43 = vmax.f32 %v203_v39, 0.0 }
 0x189   :  { %v206_v44 = vmax.f32 %v204_v42, 0.0 }
 0x18b   :  { %v207_v45 = vpack.c.bf16 %v206_v44, %v205_v43 }
 0x18d   :  { %544 = vmatmul.mubr.bf16.vlgmr.msra.gmra.mrb[4].mxu0 %v207_v45 }
 0x260   :  { %v313_v49 = vpop.f32.mrb[4].mxu0 }
 0x261   :  { %v314_v50 = vadd.f32 %v472_v48, %v313_v49  ;;  %v545_v51 = vpop.f32.mrb[5].mxu0 }
 0x262   :  { %v316_v52 = vpop.f32.mrb[6].mxu0 }
 0x263   :  { %v317_v53 = vadd.f32 %v472_v48, %v316_v52  ;;  %v546_v54 = vpop.f32.mrb[7].mxu0  ;;  %v320_v55 = vmax.f32 %v314_v50, 0.0 }
 0x265   :  { %v321_v56 = vmax.f32 %v317_v53, 0.0 }
 0x267   :  { %v322_v57 = vpack.c.bf16 %v321_v56, %v320_v55 }
 0x269   :  { %564 = vmatmul.mubr.bf16.vlgmr.msra.gmra.mrb[4].mxu1 %v322_v57 }
 0x33c   :  { %v428_v59 = vpop.f32.mrb[4].mxu1 }
 0x33d   :  { %v429_v60 = vadd.f32 %v481_v58, %v428_v59  ;;  %v565_v61 = vpop.f32.mrb[5].mxu1 }
 0x33e   :  { %v431_v62 = vpop.f32.mrb[6].mxu1 }
 0x33f   :  { %v432_v63 = vadd.f32 %v481_v58, %v431_v62  ;;  %v566_v0 = vpop.f32.mrb[7].mxu1  ;;  %v436_v1 = vsel %vm435_vm6, %v429_v60, -1e+30 }
 0x340   :  { %438 = vmax.xlane.f32.xlu1 %v436_v1 }
 0x341   :  { %v437_v2 = vsel %vm435_vm6, %v432_v63, -1e+30 }
 0x344   :  { %440 = vmax.xlane.f32.xlu1 %v437_v2 }
 0x3cd   :  { %v439_v3 = vpop.xlane.xlu1 %438 }
 0x3ce   :  { %v442_v4 = vsub.f32 %v436_v1, %v439_v3 }
 0x3d0   :  { %v444_v5 = vmul.f32 1.442695, %v442_v4 }
 0x3d1   :  { %v441_v6 = vpop.xlane.xlu1 %440 }
 0x3d2   :  { %594 = vpow2.f32 %v444_v5  ;;  %v443_v7 = vsub.f32 %v437_v2, %v441_v6 }
 0x3d4   :  { %v446_v8 = vmul.f32 1.442695, %v443_v7 }
 0x3d6   :  { %596 = vpow2.f32 %v446_v8 }
 0x3dc   :  { %v595_v9 = vpop.eup %594 }
 0x3dd   :  { %448 = vadd.xlane.f32.xlu0 %v595_v9 }
 0x3e0   :  { %v597_v10 = vpop.eup %596 }
 0x3e1   :  { %450 = vadd.xlane.f32.xlu1 %v597_v10 }
 0x46a   :  { %v449_v11 = vpop.xlane.xlu0 %448 }
 0x46b   :  { %598 = vrcp.f32 %v449_v11 }
 0x46e   :  { %v451_v12 = vpop.xlane.xlu1 %450 }
 0x46f   :  { %600 = vrcp.f32 %v451_v12 }
 0x475   :  { %v599_v13 = vpop.eup %598 }
 0x476   :  { %v453_v14 = vmul.f32 %v599_v13, %v595_v9 }
 0x478   :  { %456 = vst.msk [vmem:[%s810_s9] sm:$0xff] %vm85_vm5, %v453_v14 }
 0x479   :  { %v601_v15 = vpop.eup %600 }
 0x47a   :  { %v455_v16 = vmul.f32 %v601_v15, %v597_v10 }
 0x47c   :  { %457 = vst.msk [vmem:[%s810_s9 + $0x8] sm:$0xff] %vm85_vm5, %v455_v16 }
 0x47d   :  { %462 = vsyncpa [#allocation3], 1 }
 0x47e   :  { %463 = vsyncpa [#allocation5], 1 }

</bundles_post_ra>
